<compile_context>
chip_gen: v5e
topology: v5e:2x2
jax: 0.10.0
libtpu: 0.0.40
codegen_flags: <defaults>
</compile_context>

<pallas_src>
import functools

import numpy as np
import jax
import jax.numpy as jnp
from jax import lax
from jax.experimental import pallas as pl
from jax.experimental.pallas import tpu as pltpu

# ---------------- config (small, consistent with the module) ----------------
VOCAB_SIZE   = 32
EMBED        = 32          # config.embed
NUM_FILTERS  = 16          # config.num_filters
FILTER_SIZES = (2, 3, 4)   # config.filter_sizes
MAX_LENGTH   = 16          # config.max_length
HIDDEN_DIM   = 32          # config.hidden_dim
NUM_CLASSES  = 4           # config.num_classes
BATCH        = 2
# TODO(synk): dropout is treated as eval-mode identity (no RNG mask applied).


def _round_up(x, m):
    return (x + m - 1) // m * m


# ---------------- static layout of the packed parameter slab ----------------
LANES    = 128
KMAX     = max(FILTER_SIZES)
P_IM     = _round_up(MAX_LENGTH - min(FILTER_SIZES) + 1, 8)   # 16 im2col rows
WF_ROWS  = KMAX * VOCAB_SIZE                                  # 128 (tap-major, vocab-minor)
WF_OFF   = 0
W1_OFF   = WF_OFF + WF_ROWS                                   # 128
W2_OFF   = W1_OFF + LANES                                     # 256
B_OFF    = W2_OFF + LANES                                     # 384: rows bc, b1, b2
MASK_OFF = _round_up(B_OFF + 3, 8)                            # 392
PARAM_ROWS = MASK_OFF + P_IM                                  # 408


def _textcnn_kernel(B, L, ids_ref, params_ref, out_ref):
    V = VOCAB_SIZE
    PTOT = P_IM + KMAX - 1

    # ---- one-hot im2col slab: embedding gather + unfold fused into one-hot ----
    ids = ids_ref[...]                                            # (B, L) int32
    sentinel = jnp.full((B, PTOT - L), -1, dtype=jnp.int32)       # never matches a vocab id
    ids_pad = jnp.concatenate([ids, sentinel], axis=1)            # (B, PTOT)
    vi = lax.broadcasted_iota(jnp.int32, (B, PTOT, V), 2)
    oh = (ids_pad[:, :, None] == vi).astype(jnp.float32)          # (B, PTOT, V)
    slab = jnp.concatenate(
        [oh[:, t:t + P_IM, :] for t in range(KMAX)], axis=2)      # (B, P_IM, KMAX*V)
    slab2d = slab.reshape(B * P_IM, KMAX * V)                     # (B*P_IM, 128) layout-trivial

    # ---- single fused (embedding ∘ all conv branches) MXU matmul ----
    wf = params_ref[WF_OFF:WF_OFF + KMAX * V, :]                  # (128, 128)
    conv = jnp.dot(slab2d, wf, preferred_element_type=jnp.float32)  # (B*P_IM, 128)
    conv = conv.reshape(B, P_IM, LANES)

    # ---- max-pool with precomputed additive validity mask (0 / -1e30) ----
    mask = params_ref[MASK_OFF:MASK_OFF + P_IM, :]                # (P_IM, 128)
    pooled = jnp.max(conv + mask[None, :, :], axis=1)             # (B, 128)

    # Bias + ReLU after pooling (bias time-invariant, ReLU monotone => identical).
    bc = params_ref[B_OFF:B_OFF + 1, :]                           # (1, 128)
    feat = jnp.maximum(pooled + bc, 0.0)                          # (B, 128)
    # (embed dropout / linear1 dropout: identity in eval mode)

    # ---- classifier head (weights pre-padded to 128 lanes; zero rows/cols) ----
    w1 = params_ref[W1_OFF:W1_OFF + LANES, :]
    b1 = params_ref[B_OFF + 1:B_OFF + 2, :]
    h = jnp.maximum(jnp.dot(feat, w1, preferred_element_type=jnp.float32) + b1, 0.0)
    w2 = params_ref[W2_OFF:W2_OFF + LANES, :]
    b2 = params_ref[B_OFF + 2:B_OFF + 3, :]
    out = jnp.dot(h, w2, preferred_element_type=jnp.float32) + b2
    out_ref[...] = out.astype(out_ref.dtype)                      # (B, 128) lane-dense store


def prepare_packed_params(emb_table, conv_ws, conv_bs, w1, b1, w2, b2):
    """One-time fusion/packing of all module parameters into a single
    (PARAM_ROWS, 128) f32 slab:
      rows [0,128)    W_fused  (embedding folded into all conv branches)
      rows [128,256)  linear1 weight, zero-padded to 128x128
      rows [256,384)  linear2 weight, zero-padded to 128x128
      rows 384/385/386  conv bias / linear1 bias / linear2 bias (lane-padded)
      rows [392,408)  additive max-pool validity mask (0 valid / -1e30 invalid)
    """
    V, E = emb_table.shape
    F = NUM_FILTERS
    tbl = np.asarray(emb_table, np.float32)
    params = np.zeros((PARAM_ROWS, LANES), np.float32)

    for i, (k, w, b) in enumerate(zip(FILTER_SIZES, conv_ws, conv_bs)):
        w = np.asarray(w, np.float32)                      # (k, E, F)
        folded = np.einsum("ve,tef->tvf", tbl, w)          # (k, V, F), row index t*V+v
        params[WF_OFF:WF_OFF + k * V, i * F:(i + 1) * F] = folded.reshape(k * V, F)
        params[B_OFF, i * F:(i + 1) * F] = np.asarray(b, np.float32).reshape(F)

    w1 = np.asarray(w1, np.float32)                        # (NF, H)
    params[W1_OFF:W1_OFF + w1.shape[0], :w1.shape[1]] = w1
    params[B_OFF + 1, :np.asarray(b1).size] = np.asarray(b1, np.float32).reshape(-1)

    w2 = np.asarray(w2, np.float32)                        # (H, C)
    params[W2_OFF:W2_OFF + w2.shape[0], :w2.shape[1]] = w2
    params[B_OFF + 2, :np.asarray(b2).size] = np.asarray(b2, np.float32).reshape(-1)

    mask = np.full((P_IM, LANES), -1e30, np.float32)
    for i, k in enumerate(FILTER_SIZES):
        mask[:MAX_LENGTH - k + 1, i * F:(i + 1) * F] = 0.0
    params[MASK_OFF:MASK_OFF + P_IM, :] = mask

    return jnp.asarray(params)


def textcnn_forward(tokens, params):
    """tokens: (B, L) int32.  params: packed (PARAM_ROWS, 128) f32 slab."""
    B, L = tokens.shape
    assert L == MAX_LENGTH, "pool mask was baked for MAX_LENGTH"
    assert L >= max(FILTER_SIZES), "every conv branch needs >=1 valid position"

    kernel = functools.partial(_textcnn_kernel, B, L)
    vmem = pl.BlockSpec(memory_space=pltpu.MemorySpace.VMEM)

    # Gridless: whole problem fits one invocation (~200 KiB of VMEM data).
    # For large batches on v7x, add a leading batch grid axis with
    # compiler_params=pltpu.CompilerParams(dimension_semantics=("parallel",)).
    out_pad = pl.pallas_call(
        kernel,
        out_shape=jax.ShapeDtypeStruct((B, LANES), jnp.float32),
        in_specs=[vmem, vmem],
        out_specs=vmem,
    )(tokens.astype(jnp.int32), params)
    return out_pad[:, :NUM_CLASSES]


def _reference_forward(tokens, emb_table, conv_ws, conv_bs, w1, b1, w2, b2):
    """Pure-JAX reference mirroring the PyTorch forward (eval mode)."""
    emb = jnp.take(emb_table, tokens, axis=0)                     # (B, L, E)
    pooled = []
    for w, b, k in zip(conv_ws, conv_bs, FILTER_SIZES):
        P = emb.shape[1] - k + 1
        acc = jnp.zeros((emb.shape[0], P, w.shape[-1]), jnp.float32)
        for t in range(k):
            acc = acc + jnp.einsum("bpe,ef->bpf", emb[:, t:t + P, :], w[t])
        acc = jax.nn.relu(acc + b[None, :, :])
        pooled.append(jnp.max(acc, axis=1))
    feat = jnp.concatenate(pooled, axis=-1)
    h = jax.nn.relu(feat @ w1 + b1)
    return h @ w2 + b2


if __name__ == "__main__":
    key = jax.random.PRNGKey(0)
    keys = jax.random.split(key, 16)

    # Embedding table, padding_idx=0 -> row 0 is zeros.
    emb_table = 0.1 * jax.random.normal(keys[0], (VOCAB_SIZE, EMBED), jnp.float32)
    emb_table = emb_table.at[0].set(0.0)

    # Conv1d weights: PyTorch shape (F, E, k) -> layout (k, E, F).
    conv_ws, conv_bs = [], []
    for i, k in enumerate(FILTER_SIZES):
        w = 0.1 * jax.random.normal(keys[1 + i], (k, EMBED, NUM_FILTERS), jnp.float32)
        b = 0.1 * jax.random.normal(keys[5 + i], (1, NUM_FILTERS), jnp.float32)
        conv_ws.append(w)
        conv_bs.append(b)

    # Linear layers: PyTorch (out, in) -> pre-transposed (in, out).
    in1 = NUM_FILTERS * len(FILTER_SIZES)
    w1 = 0.1 * jax.random.normal(keys[9], (in1, HIDDEN_DIM), jnp.float32)
    b1 = 0.1 * jax.random.normal(keys[10], (1, HIDDEN_DIM), jnp.float32)
    w2 = 0.1 * jax.random.normal(keys[11], (HIDDEN_DIM, NUM_CLASSES), jnp.float32)
    b2 = 0.1 * jax.random.normal(keys[12], (1, NUM_CLASSES), jnp.float32)

    # Token ids (avoid padding id 0 so the test exercises real rows too).
    tokens = jax.random.randint(keys[13], (BATCH, MAX_LENGTH), 1, VOCAB_SIZE,
                                dtype=jnp.int32)

    # One-time parameter fusion + packing (outside the hot path).
    params = prepare_packed_params(emb_table, conv_ws, conv_bs, w1, b1, w2, b2)

    out = textcnn_forward(tokens, params)
    out = jax.block_until_ready(out)

    ref = _reference_forward(tokens, emb_table, conv_ws, conv_bs, w1, b1, w2, b2)
    assert out.shape == (BATCH, NUM_CLASSES)
    assert jnp.allclose(out, ref, atol=1e-4, rtol=1e-4), (out, ref)

    print("KERNEL_OK")
</pallas_src>

<mosaic_0001>
module attributes {stable_mosaic.version = 11 : i64} {
  func.func @_textcnn_kernel(%arg0: memref<2x16xi32, #tpu.memory_space<vmem>>, %arg1: memref<408x128xf32, #tpu.memory_space<vmem>>, %arg2: memref<2x128xf32, #tpu.memory_space<vmem>>) attributes {dimension_semantics = [], scalar_prefetch = 0 : i64, scratch_operands = 0 : i64, tpu.core_type = #tpu.core_type<tc>} {
    %c0 = arith.constant 0 : index
    %c0_0 = arith.constant 0 : index
    %0 = vector.load %arg0[%c0, %c0_0] : memref<2x16xi32, #tpu.memory_space<vmem>>, vector<2x16xi32>
    %c-1_i32 = arith.constant -1 : i32
    %1 = vector.broadcast %c-1_i32 : i32 to vector<2x3xi32>
    %2 = tpu.concatenate %0, %1 in 1 : vector<2x16xi32>, vector<2x3xi32> -> vector<2x19xi32>
    %3 = tpu.iota {dimensions = array<i32: 2>} : vector<2x19x32xi32>
    %4 = vector.shape_cast %2 : vector<2x19xi32> to vector<2x19x1xi32>
    %5 = vector.broadcast %4 : vector<2x19x1xi32> to vector<2x19x32xi32>
    %6 = arith.cmpi eq, %5, %3 : vector<2x19x32xi32>
    %7 = arith.extui %6 : vector<2x19x32xi1> to vector<2x19x32xi32>
    %8 = arith.sitofp %7 : vector<2x19x32xi32> to vector<2x19x32xf32>
    %9 = vector.extract_strided_slice %8 {offsets = [0, 0, 0], sizes = [2, 16, 32], strides = [1, 1, 1]} : vector<2x19x32xf32> to vector<2x16x32xf32>
    %10 = vector.extract_strided_slice %8 {offsets = [0, 1, 0], sizes = [2, 16, 32], strides = [1, 1, 1]} : vector<2x19x32xf32> to vector<2x16x32xf32>
    %11 = vector.extract_strided_slice %8 {offsets = [0, 2, 0], sizes = [2, 16, 32], strides = [1, 1, 1]} : vector<2x19x32xf32> to vector<2x16x32xf32>
    %12 = vector.extract_strided_slice %8 {offsets = [0, 3, 0], sizes = [2, 16, 32], strides = [1, 1, 1]} : vector<2x19x32xf32> to vector<2x16x32xf32>
    %13 = tpu.concatenate %9, %10, %11, %12 in 2 : vector<2x16x32xf32>, vector<2x16x32xf32>, vector<2x16x32xf32>, vector<2x16x32xf32> -> vector<2x16x128xf32>
    %14 = vector.shape_cast %13 : vector<2x16x128xf32> to vector<32x128xf32>
    %c0_1 = arith.constant 0 : index
    %c0_2 = arith.constant 0 : index
    %15 = vector.load %arg1[%c0_1, %c0_2] : memref<408x128xf32, #tpu.memory_space<vmem>>, vector<128x128xf32>
    %cst = arith.constant dense<0.000000e+00> : vector<32x128xf32>
    %16 = tpu.matmul %14, %15, %cst {dimension_numbers = #tpu.dot_dimension_numbers<[1], [0], [0], [1], [0, 0, 1, 1], [], []>} : vector<32x128xf32>, vector<128x128xf32>, vector<32x128xf32> -> vector<32x128xf32>
    %17 = vector.shape_cast %16 : vector<32x128xf32> to vector<2x16x128xf32>
    %c392 = arith.constant 392 : index
    %c0_3 = arith.constant 0 : index
    %18 = vector.load %arg1[%c392, %c0_3] : memref<408x128xf32, #tpu.memory_space<vmem>>, vector<16x128xf32>
    %19 = vector.shape_cast %18 : vector<16x128xf32> to vector<1x16x128xf32>
    %20 = vector.broadcast %19 : vector<1x16x128xf32> to vector<2x16x128xf32>
    %21 = arith.addf %17, %20 : vector<2x16x128xf32>
    %cst_4 = arith.constant dense<0xFF800000> : vector<2x128xf32>
    %22 = vector.multi_reduction <maximumf>, %21, %cst_4 [1] : vector<2x16x128xf32> to vector<2x128xf32>
    %c384 = arith.constant 384 : index
    %c0_5 = arith.constant 0 : index
    %23 = vector.load %arg1[%c384, %c0_5] : memref<408x128xf32, #tpu.memory_space<vmem>>, vector<1x128xf32>
    %24 = vector.broadcast %23 : vector<1x128xf32> to vector<2x128xf32>
    %25 = arith.addf %22, %24 : vector<2x128xf32>
    %cst_6 = arith.constant 0.000000e+00 : f32
    %26 = vector.broadcast %cst_6 : f32 to vector<2x128xf32>
    %27 = arith.maximumf %25, %26 : vector<2x128xf32>
    %c128 = arith.constant 128 : index
    %c0_7 = arith.constant 0 : index
    %28 = vector.load %arg1[%c128, %c0_7] : memref<408x128xf32, #tpu.memory_space<vmem>>, vector<128x128xf32>
    %c385 = arith.constant 385 : index
    %c0_8 = arith.constant 0 : index
    %29 = vector.load %arg1[%c385, %c0_8] : memref<408x128xf32, #tpu.memory_space<vmem>>, vector<1x128xf32>
    %cst_9 = arith.constant dense<0.000000e+00> : vector<2x128xf32>
    %30 = tpu.matmul %27, %28, %cst_9 {dimension_numbers = #tpu.dot_dimension_numbers<[1], [0], [0], [1], [0, 0, 1, 1], [], []>} : vector<2x128xf32>, vector<128x128xf32>, vector<2x128xf32> -> vector<2x128xf32>
    %31 = vector.broadcast %29 : vector<1x128xf32> to vector<2x128xf32>
    %32 = arith.addf %30, %31 : vector<2x128xf32>
    %cst_10 = arith.constant 0.000000e+00 : f32
    %33 = vector.broadcast %cst_10 : f32 to vector<2x128xf32>
    %34 = arith.maximumf %32, %33 : vector<2x128xf32>
    %c256 = arith.constant 256 : index
    %c0_11 = arith.constant 0 : index
    %35 = vector.load %arg1[%c256, %c0_11] : memref<408x128xf32, #tpu.memory_space<vmem>>, vector<128x128xf32>
    %c386 = arith.constant 386 : index
    %c0_12 = arith.constant 0 : index
    %36 = vector.load %arg1[%c386, %c0_12] : memref<408x128xf32, #tpu.memory_space<vmem>>, vector<1x128xf32>
    %cst_13 = arith.constant dense<0.000000e+00> : vector<2x128xf32>
    %37 = tpu.matmul %34, %35, %cst_13 {dimension_numbers = #tpu.dot_dimension_numbers<[1], [0], [0], [1], [0, 0, 1, 1], [], []>} : vector<2x128xf32>, vector<128x128xf32>, vector<2x128xf32> -> vector<2x128xf32>
    %38 = vector.broadcast %36 : vector<1x128xf32> to vector<2x128xf32>
    %39 = arith.addf %37, %38 : vector<2x128xf32>
    %c0_14 = arith.constant 0 : index
    %c0_15 = arith.constant 0 : index
    %40 = vector.load %arg2[%c0_14, %c0_15] : memref<2x128xf32, #tpu.memory_space<vmem>>, vector<2x128xf32>
    tpu.vector_store %arg2[%c0_14, %c0_15], %39 {strides = array<i32>} : memref<2x128xf32, #tpu.memory_space<vmem>>, vector<2x128xf32>,
    return
  }
}

</mosaic_0001>

<bundles_post_ra>
// kernel: tpu_custom_call.1
= control target key start
LH: loop header
LB: loop body
LE: loop exit
PB: predicated region body
PF: predicated region fallthrough
CT: control target
= control target key end

     0   :  { %7 = vsyncpa [#allocation3], 0  ;;  %s580_s0 = inlined_call_operand.hbm [shape: s32[2,16], index: 0, kind: input, shape index: {}]   ;;  %s581_s1 = inlined_call_operand.hbm [shape: f32[408,128], index: 1, kind: input, shape index: {}]   ;;  %s582_s2 = inlined_call_operand.hbm [shape: f32[2,128], index: 2, kind: output, shape index: {}]  }
   0x1   :  { %8 = vsyncpa [#allocation6], 0 }
   0x2   :  { %9 = vsyncpa [#allocation4], 0  ;;  %s15_s11 = sshll.u32 %s580_s0, 4  ;;  %s499_s12 = smov [#allocation2]   ;;  %s16_s11 = int_to_ptr.hbm [resolvable:$true] %s15_s11 }
   0x3   :  { %s17_s13 = sshll.u32 %s499_s12, 4  ;;  %s25_s16 = sshll.u32 %s581_s1, 4  ;;  %s18_s13 = int_to_ptr.vmem [resolvable:$true] %s17_s13  ;;  %s26_s16 = int_to_ptr.hbm [resolvable:$true] %s25_s16 }
   0x4   :  { %20 = dma.hbm_to_vmem [thread:$0]  %s16_s11, 32, %s18_s13, [#allocation3]  }
   0x5   :  { %s500_s17 = smov [#allocation5]   ;;  %s501_s19 = smov 128  }
   0x6   :  { %s27_s18 = sshll.u32 %s500_s17, 4  ;;  %s502_s20 = smov 8   ;;  %s28_s18 = int_to_ptr.vmem [resolvable:$true] %s27_s18 }
   0x7   :  { %33 = dma.hbm_to_vmem [thread:$0]  %s26_s16, 6528, %s28_s18, [#allocation6], %s501_s19, %s501_s19, %s502_s20  }
   0x8   :  { %493 = dma.done.wait [#allocation3], 32  }
   0x9   :  { %494 = vsyncadd [#allocation3], 4294967264 }
   0xa   :  { %495 = dma.done.wait [#allocation6], 6528  }
   0xb   :  { %496 = vsyncadd [#allocation6], 4294960768  ;;  %v45_v0 = vlaneseq  ;;  %vm43_vm0 = vcmask 130048   ;;  %v42_v3 = vld [vmem:[#allocation2] sm:$0x3]  ;;  %v503_v13 = vmov 0.0  }
   0xc   :  { %v44_v4 = vsel %vm43_vm0, %v42_v3, 4294967295  ;;  %v208_v11 = vld [vmem:[#allocation5 + $0x78] sm:$0xff]  ;;  %vm155_vm4 = vcmask 1044480   ;;  %vm132_vm5 = vcmask 1045504   ;;  %vm109_vm6 = vcmask 1046528   ;;  %s504_s0 = smov 96  }
   0xd   :  { %v49_v1 = vshrl.u32 %v45_v0, 7  ;;  %v66_v5 = vperm.slane %v44_v4, 1  ;;  %v47_v6 = vperm.slane %v44_v4, 0  ;;  %v46_v8 = vand.u32 127, %v45_v0  ;;  %372 = vmatpush.msra.mxu3 %v208_v11  ;;  %209 = vmatpush.msra.mxu0 %v208_v11  ;;  %s505_s1 = smov 32   ;;  %s506_s21 = smov 64  }
   0xe   :  { %v207_v56 = vld [vmem:[#allocation5 + $0x70] sm:$0xff]  ;;  %v206_v57 = vld [vmem:[#allocation5 + $0x68] sm:$0xff]  ;;  %v205_v58 = vld [vmem:[#allocation5 + $0x60] sm:$0xff]  ;;  %vm178_vm10 = vcmask 261120   ;;  %vm183_vm11 = vcmask 523264   ;;  %vm188_vm12 = vcmask 785408  }
   0xf   :  { %399 = vset.pattern.permute.xlu1 %v49_v1  ;;  %397 = vset.pattern.permute.xlu0 %v49_v1  ;;  %v62_v2 = vadd.s32 16, %v49_v1  ;;  %v56_v7 = vadd.s32 8, %v49_v1  ;;  %v204_v59 = vld [vmem:[#allocation5 + $0x58] sm:$0xff]  ;;  %v203_v60 = vld [vmem:[#allocation5 + $0x50] sm:$0xff]  ;;  %v202_v61 = vld [vmem:[#allocation5 + $0x48] sm:$0xff]  ;;  %vm285_vm13 = vcmask 1041409  }
  0x10   :  { %373 = vmatpush.msra.mxu3 %v207_v56  ;;  %210 = vmatpush.msra.mxu0 %v207_v56  ;;  %v201_v62 = vld [vmem:[#allocation5 + $0x40] sm:$0xff]  ;;  %v200_v63 = vld [vmem:[#allocation5 + $0x38] sm:$0xff]  ;;  %v199_v0 = vld [vmem:[#allocation5 + $0x30] sm:$0xff]  ;;  %s507_s22 = smov [#allocation7]   ;;  %s355_s26 = sshll.u32 %s582_s2, 4  ;;  %s356_s26 = int_to_ptr.hbm [resolvable:$true] %s355_s26 }
  0x11   :  { %401 = vset.pattern.permute.xlu2 %v62_v2  ;;  %v198_v1 = vld [vmem:[#allocation5 + $0x28] sm:$0xff]  ;;  %v196_v3 = vld [vmem:[#allocation5 + $0x18] sm:$0xff]  ;;  %v195_v4 = vld [vmem:[#allocation5 + $0x10] sm:$0xff]  ;;  %s353_s23 = sshll.u32 %s507_s22, 4  ;;  %s354_s23 = int_to_ptr.vmem [resolvable:$true] %s353_s23 }
  0x12   :  { %374 = vmatpush.msra.mxu3 %v206_v57  ;;  %211 = vmatpush.msra.mxu0 %v206_v57  ;;  %v238_v56 = vld [vmem:[#allocation5 + $0x188] sm:$0xff]  ;;  %v239_v57 = vld [vmem:[#allocation5 + $0x190] sm:$0xff] }
  0x14   :  { %375 = vmatpush.msra.mxu3 %v205_v58  ;;  %212 = vmatpush.msra.mxu0 %v205_v58  ;;  %v320_v58 = vld [vmem:[#allocation5 + $0x158] sm:$0xff] }
  0x16   :  { %376 = vmatpush.msra.mxu3 %v204_v59  ;;  %213 = vmatpush.msra.mxu0 %v204_v59 }
  0x17   :  { %71 = vperm.xlu0 %397, %v66_v5   ;;  %52 = vperm.xlu1 %399, %v47_v6  }
  0x18   :  { %377 = vmatpush.msra.mxu3 %v203_v60  ;;  %214 = vmatpush.msra.mxu0 %v203_v60 }
  0x19   :  { %83 = vperm.xlu2 %401, %v66_v5  }
  0x1a   :  { %378 = vmatpush.msra.mxu3 %v202_v61  ;;  %215 = vmatpush.msra.mxu0 %v202_v61  ;;  %v319_v61 = vld [vmem:[#allocation5 + $0x150] sm:$0xff] }
  0x1c   :  { %379 = vmatpush.msra.mxu3 %v201_v62  ;;  %216 = vmatpush.msra.mxu0 %v201_v62 }
  0x1e   :  { %380 = vmatpush.msra.mxu3 %v200_v63  ;;  %217 = vmatpush.msra.mxu0 %v200_v63 }
  0x1f   :  { %398 = vset.pattern.permute.xlu0 %v56_v7  ;;  %400 = vset.pattern.permute.xlu1 %v56_v7 }
  0x20   :  { %381 = vmatpush.msra.mxu3 %v199_v0  ;;  %218 = vmatpush.msra.mxu0 %v199_v0 }
  0x21   :  { %64 = vperm.xlu2 %401, %v47_v6  }
  0x22   :  { %382 = vmatpush.msra.mxu3 %v198_v1  ;;  %219 = vmatpush.msra.mxu0 %v198_v1 }
  0x27   :  { %77 = vperm.xlu0 %398, %v66_v5   ;;  %58 = vperm.xlu1 %400, %v47_v6   ;;  %v194_v5 = vld [vmem:[#allocation5 + $0x8] sm:$0xff]  ;;  %v193_v6 = vld [vmem:[#allocation5] sm:$0xff] }
  0x2f   :  { %417 = vset.pattern.permute.xlu0 %v62_v2  ;;  %v197_v2 = vld [vmem:[#allocation5 + $0x20] sm:$0xff] }
  0x30   :  { %383 = vmatpush.msra.mxu3 %v197_v2  ;;  %220 = vmatpush.msra.mxu0 %v197_v2  ;;  %v318_v2 = vld [vmem:[#allocation5 + $0x148] sm:$0xff] }
  0x32   :  { %384 = vmatpush.msra.mxu3 %v196_v3  ;;  %221 = vmatpush.msra.mxu0 %v196_v3 }
  0x34   :  { %385 = vmatpush.msra.mxu3 %v195_v4  ;;  %222 = vmatpush.msra.mxu0 %v195_v4 }
  0x36   :  { %386 = vmatpush.msra.mxu3 %v194_v5  ;;  %223 = vmatpush.msra.mxu0 %v194_v5  ;;  %v317_v5 = vld [vmem:[#allocation5 + $0x140] sm:$0xff] }
  0x38   :  { %387 = vmatpush.msra.mxu3 %v193_v6  ;;  %224 = vmatpush.msra.mxu0 %v193_v6 }
  0x73   :  { %v84_v12 = vpop.permute.xlu2 %83 }
  0x74   :  { %vm90_vm3 = vcmp.eq.s32.totalorder %v84_v12, %v46_v8 }
  0x75   :  { %v371_v16 = vsel %vm90_vm3, 1.0, %v503_v13 }
  0x76   :  { %v164_v30 = vrot.slane %v371_v16, 3  ;;  %v118_v44 = vrot.slane %v371_v16, 1  ;;  %v141_v45 = vrot.slane %v371_v16, 2 }
  0x7b   :  { %v65_v41 = vpop.permute.xlu2 %64 }
  0x7c   :  { %vm87_vm9 = vcmp.eq.s32.totalorder %v65_v41, %v46_v8  ;;  %v273_v41 = vld [vmem:[#allocation5 + $0xc8] sm:$0xff] }
  0x7d   :  { %v368_v47 = vsel %vm87_vm9, 1.0, %v503_v13 }
  0x7e   :  { %v159_v50 = vrot.slane %v368_v47, 3  ;;  %v113_v51 = vrot.slane %v368_v47, 1  ;;  %v136_v52 = vrot.slane %v368_v47, 2  ;;  %v266_v47 = vld [vmem:[#allocation5 + $0x90] sm:$0xff] }
  0x89   :  { %v72_v9 = vpop.permute.xlu0 %71  ;;  %v53_v10 = vpop.permute.xlu1 %52 }
  0x8a   :  { %vm88_vm1 = vcmp.eq.s32.totalorder %v72_v9, %v46_v8  ;;  %vm85_vm2 = vcmp.eq.s32.totalorder %v53_v10, %v46_v8 }
  0x8b   :  { %v529_v14 = vsel %vm88_vm1, 1.0, %v503_v13  ;;  %v531_v15 = vsel %vm85_vm2, 1.0, %v503_v13 }
  0x8c   :  { %v115_v19 = vrot.slane %v529_v14, 1  ;;  %v138_v20 = vrot.slane %v529_v14, 2  ;;  %v161_v21 = vrot.slane %v529_v14, 3  ;;  %v110_v22 = vrot.slane %v531_v15, 1 }
  0x8d   :  { %v133_v29 = vrot.slane %v531_v15, 2  ;;  %v156_v39 = vrot.slane %v531_v15, 3 }
  0x99   :  { %v78_v17 = vpop.permute.xlu0 %77  ;;  %v59_v18 = vpop.permute.xlu1 %58 }
  0x9a   :  { %vm89_vm7 = vcmp.eq.s32.totalorder %v78_v17, %v46_v8  ;;  %vm86_vm8 = vcmp.eq.s32.totalorder %v59_v18, %v46_v8 }
  0x9b   :  { %v537_v23 = vsel %vm89_vm7, 1.0, %v503_v13  ;;  %v539_v24 = vsel %vm86_vm8, 1.0, %v503_v13 }
  0x9c   :  { %v116_v25 = vrot.slane %v537_v23, 1  ;;  %v139_v26 = vrot.slane %v537_v23, 2  ;;  %v162_v27 = vrot.slane %v537_v23, 3  ;;  %v111_v28 = vrot.slane %v539_v24, 1 }
  0x9d   :  { %v134_v31 = vrot.slane %v539_v24, 2  ;;  %v157_v32 = vrot.slane %v539_v24, 3 }
  0x9e   :  { %v163_v33 = vsel %vm155_vm4, %v161_v21, %v162_v27  ;;  %v140_v34 = vsel %vm132_vm5, %v138_v20, %v139_v26  ;;  %v112_v35 = vsel %vm109_vm6, %v110_v22, %v111_v28  ;;  %v117_v36 = vsel %vm109_vm6, %v115_v19, %v116_v25 }
  0x9f   :  { %170 = vrot.lane.b32.xlu0 %v163_v33, %s504_s0  ;;  %v135_v37 = vsel %vm132_vm5, %v133_v29, %v134_v31  ;;  %v402_v38 = vpack.i.bf16 %v112_v35, %v117_v36  ;;  %v158_v42 = vsel %vm155_vm4, %v156_v39, %v157_v32  ;;  %v165_v43 = vsel %vm155_vm4, %v162_v27, %v164_v30  ;;  %v278_v36 = vld [vmem:[#allocation5 + $0xf0] sm:$0xff]  ;;  %v275_v39 = vld [vmem:[#allocation5 + $0xd8] sm:$0xff] }
  0xa0   :  { %v407_v40 = vpack.i.bf16 %v135_v37, %v140_v34  ;;  %v412_v46 = vpack.i.bf16 %v165_v43, %v158_v42  ;;  %v119_v48 = vsel %vm109_vm6, %v116_v25, %v118_v44  ;;  %v142_v49 = vsel %vm132_vm5, %v139_v26, %v141_v45  ;;  %v277_v37 = vld [vmem:[#allocation5 + $0xe8] sm:$0xff]  ;;  %v271_v42 = vld [vmem:[#allocation5 + $0xb8] sm:$0xff]  ;;  %v270_v43 = vld [vmem:[#allocation5 + $0xb0] sm:$0xff] }
  0xa1   :  { %403 = vrot.lane.b32.xlu1 %v402_v38, %s505_s1  ;;  %v160_v53 = vsel %vm155_vm4, %v157_v32, %v159_v50  ;;  %v114_v54 = vsel %vm109_vm6, %v111_v28, %v113_v51  ;;  %v137_v55 = vsel %vm132_vm5, %v134_v31, %v136_v52  ;;  %v276_v38 = vld [vmem:[#allocation5 + $0xe0] sm:$0xff]  ;;  %v269_v44 = vld [vmem:[#allocation5 + $0xa8] sm:$0xff]  ;;  %v324_v52 = vld [vmem:[#allocation5 + $0x178] sm:$0xff] }
  0xa2   :  { %408 = vrot.lane.b32.xlu2 %v407_v40, %s506_s21  ;;  %v274_v40 = vld [vmem:[#allocation5 + $0xd0] sm:$0xff]  ;;  %v268_v45 = vld [vmem:[#allocation5 + $0xa0] sm:$0xff]  ;;  %327 = vmatpush.msra.mxu2 %v324_v52 }
  0xa7   :  { %413 = vrot.lane.b32.xlu0 %v412_v46, %s504_s0  ;;  %v267_v46 = vld [vmem:[#allocation5 + $0x98] sm:$0xff] }
  0xa9   :  { %126 = vrot.lane.b32.xlu1 %v119_v48, %s505_s1  ;;  %v265_v48 = vld [vmem:[#allocation5 + $0x88] sm:$0xff] }
  0xaa   :  { %149 = vrot.lane.b32.xlu2 %v142_v49, %s506_s21  ;;  %v264_v49 = vld [vmem:[#allocation5 + $0x80] sm:$0xff] }
  0xaf   :  { %168 = vrot.lane.b32.xlu0 %v160_v53, %s504_s0  ;;  %v323_v53 = vld [vmem:[#allocation5 + $0x170] sm:$0xff] }
  0xb0   :  { %328 = vmatpush.msra.mxu2 %v323_v53 }
  0xb1   :  { %122 = vrot.lane.b32.xlu1 %v114_v54, %s505_s1  ;;  %v322_v54 = vld [vmem:[#allocation5 + $0x168] sm:$0xff] }
  0xb2   :  { %145 = vrot.lane.b32.xlu2 %v137_v55, %s506_s21  ;;  %v321_v55 = vld [vmem:[#allocation5 + $0x160] sm:$0xff]  ;;  %329 = vmatpush.msra.mxu2 %v322_v54 }
  0xb4   :  { %330 = vmatpush.msra.mxu2 %v321_v55 }
  0xb6   :  { %331 = vmatpush.msra.mxu2 %v320_v58 }
  0xb8   :  { %332 = vmatpush.msra.mxu2 %v319_v61 }
  0xba   :  { %333 = vmatpush.msra.mxu2 %v318_v2 }
  0xbc   :  { %334 = vmatpush.msra.mxu2 %v317_v5 }
  0xfc   :  { %v409_v7 = vpop.permute.xlu2 %408 }
  0xfd   :  { %v410_v12 = vunpack.i.l.bf16 %v409_v7  ;;  %v411_v19 = vunpack.i.h.bf16 %v409_v7 }
 0x104   :  { %v150_v21 = vpop.permute.xlu2 %149 }
 0x10c   :  { %v146_v31 = vpop.permute.xlu2 %145 }
 0x111   :  { %v171_v8 = vpop.permute.xlu0 %170 }
 0x113   :  { %v404_v9 = vpop.permute.xlu1 %403 }
 0x114   :  { %v406_v10 = vunpack.i.h.bf16 %v404_v9  ;;  %v405_v11 = vunpack.i.l.bf16 %v404_v9 }
 0x116   :  { %v181_v13 = vsel %vm178_vm10, %v529_v14, %v405_v11  ;;  %v179_v18 = vsel %vm178_vm10, %v531_v15, %v406_v10  ;;  %v315_v11 = vld [vmem:[#allocation5 + $0x130] sm:$0xff] }
 0x117   :  { %v186_v16 = vsel %vm183_vm11, %v181_v13, %v410_v12  ;;  %v184_v26 = vsel %vm183_vm11, %v179_v18, %v411_v19  ;;  %v313_v19 = vld [vmem:[#allocation5 + $0x120] sm:$0xff] }
 0x118   :  { %v191_v17 = vsel %vm188_vm12, %v186_v16, %v171_v8  ;;  %v316_v8 = vld [vmem:[#allocation5 + $0x138] sm:$0xff]  ;;  %v314_v16 = vld [vmem:[#allocation5 + $0x128] sm:$0xff] }
 0x119   :  { %v414_v20 = vpop.permute.xlu0 %413  ;;  %231 = vmatmul.f32.vlgmr.msra.gmra.mxu3 %v191_v17  ;;  %335 = vmatpush.msra.mxu2 %v316_v8 }
 0x11a   :  { %v415_v22 = vunpack.i.l.bf16 %v414_v20  ;;  %v416_v29 = vunpack.i.h.bf16 %v414_v20 }
 0x11b   :  { %v127_v25 = vpop.permute.xlu1 %126  ;;  %336 = vmatpush.msra.mxu2 %v315_v11 }
 0x11c   :  { %v182_v27 = vsel %vm178_vm10, %v537_v23, %v127_v25  ;;  %v189_v14 = vsel %vm188_vm12, %v184_v26, %v415_v22  ;;  %v279_v23 = vld [vmem:[#allocation5 + $0xf8] sm:$0xff]  ;;  %v418_v22 = vld [vmem:[#allocation5 + $0x180] ss:$0 sm:$0xff] }
 0x11d   :  { %225 = vmatmul.f32.vlgmr.msra.gmra.mxu0 %v189_v14  ;;  %v187_v28 = vsel %vm183_vm11, %v182_v27, %v150_v21  ;;  %288 = vmatpush.msra.mxu1 %v279_v23  ;;  %v312_v25 = vld [vmem:[#allocation5 + $0x118] sm:$0xff] }
 0x11e   :  { %v192_v30 = vsel %vm188_vm12, %v187_v28, %v416_v29  ;;  %337 = vmatpush.msra.mxu2 %v314_v16 }
 0x11f   :  { %289 = vmatpush.msra.mxu1 %v278_v36 }
 0x120   :  { %338 = vmatpush.msra.mxu2 %v313_v19 }
 0x121   :  { %234 = vmatmul.f32.gmra.mxu3 %v192_v30  ;;  %v169_v33 = vpop.permute.xlu0 %168  ;;  %290 = vmatpush.msra.mxu1 %v277_v37 }
 0x122   :  { %339 = vmatpush.msra.mxu2 %v312_v25 }
 0x123   :  { %v123_v15 = vpop.permute.xlu1 %122  ;;  %291 = vmatpush.msra.mxu1 %v276_v38  ;;  %v420_v38 = vld [vmem:[#allocation5 + $0x182] ss:$0 sm:$0xff] }
 0x124   :  { %v180_v32 = vsel %vm178_vm10, %v539_v24, %v123_v15  ;;  %v272_v24 = vld [vmem:[#allocation5 + $0xc0] sm:$0xff] }
 0x125   :  { %v185_v34 = vsel %vm183_vm11, %v180_v32, %v146_v31  ;;  %292 = vmatpush.msra.mxu1 %v275_v39  ;;  %v311_v32 = vld [vmem:[#allocation5 + $0x110] sm:$0xff] }
 0x126   :  { %v190_v35 = vsel %vm188_vm12, %v185_v34, %v169_v33  ;;  %340 = vmatpush.msra.mxu2 %v311_v32  ;;  %v310_v33 = vld [vmem:[#allocation5 + $0x108] sm:$0xff]  ;;  %v309_v34 = vld [vmem:[#allocation5 + $0x100] sm:$0xff] }
 0x127   :  { %228 = vmatmul.f32.gmra.mxu0 %v190_v35  ;;  %293 = vmatpush.msra.mxu1 %v274_v40  ;;  %v419_v35 = vld [vmem:[#allocation5 + $0x181] ss:$0 sm:$0xff] }
 0x128   :  { %341 = vmatpush.msra.mxu2 %v310_v33 }
 0x129   :  { %294 = vmatpush.msra.mxu1 %v273_v41 }
 0x12a   :  { %342 = vmatpush.msra.mxu2 %v309_v34 }
 0x12b   :  { %295 = vmatpush.msra.mxu1 %v272_v24 }
 0x12d   :  { %296 = vmatpush.msra.mxu1 %v271_v42 }
 0x12f   :  { %297 = vmatpush.msra.mxu1 %v270_v43 }
 0x131   :  { %298 = vmatpush.msra.mxu1 %v269_v44 }
 0x133   :  { %299 = vmatpush.msra.mxu1 %v268_v45 }
 0x135   :  { %300 = vmatpush.msra.mxu1 %v267_v46 }
 0x137   :  { %301 = vmatpush.msra.mxu1 %v266_v47 }
 0x139   :  { %302 = vmatpush.msra.mxu1 %v265_v48 }
 0x13b   :  { %303 = vmatpush.msra.mxu1 %v264_v49 }
 0x19a   :  { %v226_v50 = vpop.f32.mrf.mxu0 }
 0x19b   :  { %v240_v62 = vadd.f32 %v238_v56, %v226_v50 }
 0x19c   :  { %v232_v51 = vpop.f32.mrf.mxu3 }
 0x19d   :  { %v242_v63 = vadd.f32 %v238_v56, %v232_v51 }
 0x1a4   :  { %v229_v59 = vpop.f32.mrf.mxu0  ;;  %v235_v60 = vpop.f32.mrf.mxu3 }
 0x1a5   :  { %v241_v0 = vadd.f32 %v239_v57, %v229_v59  ;;  %v243_v1 = vadd.f32 %v239_v57, %v235_v60 }
 0x1a7   :  { %v244_v3 = vmax.f32 %v240_v62, %v241_v0  ;;  %v251_v4 = vmax.f32 %v242_v63, %v243_v1 }
 0x1a9   :  { %v245_v6 = vrot.slane %v244_v3, 4  ;;  %v252_v7 = vrot.slane %v251_v4, 4 }
 0x1ab   :  { %v246_v9 = vmax.f32 %v244_v3, %v245_v6  ;;  %v253_v10 = vmax.f32 %v251_v4, %v252_v7 }
 0x1ad   :  { %v247_v12 = vrot.slane %v246_v9, 2  ;;  %v254_v13 = vrot.slane %v253_v10, 2 }
 0x1af   :  { %v248_v17 = vmax.f32 %v246_v9, %v247_v12  ;;  %v255_v18 = vmax.f32 %v253_v10, %v254_v13 }
 0x1b1   :  { %v249_v20 = vrot.slane %v248_v17, 1  ;;  %v256_v21 = vrot.slane %v255_v18, 1 }
 0x1b3   :  { %v250_v26 = vmax.f32 %v248_v17, %v249_v20  ;;  %v257_v27 = vmax.f32 %v255_v18, %v256_v21 }
 0x1b5   :  { %v260_v14 = vadd.f32 %v418_v22, %v250_v26  ;;  %v261_v28 = vadd.f32 %v418_v22, %v257_v27 }
 0x1b7   :  { %v263_v29 = vmax.f32 %v261_v28, 0.0  ;;  %v262_v30 = vmax.f32 %v260_v14, 0.0 }
 0x1b9   :  { %v284_v15 = vrot.slane %v263_v29, 7 }
 0x1bb   :  { %v286_v31 = vsel %vm285_vm13, %v284_v15, %v262_v30 }
 0x1bc   :  { %304 = vmatmul.f32.vlgmr.msra.gmra.mxu1 %v286_v31 }
 0x239   :  { %v305_v23 = vpop.f32.mrf.mxu1 }
 0x23a   :  { %v306_v36 = vadd.f32 %v419_v35, %v305_v23 }
 0x23c   :  { %v308_v37 = vmax.f32 %v306_v36, 0.0 }
 0x23e   :  { %343 = vmatmul.f32.vlgmr.msra.gmra.mxu2 %v308_v37 }
 0x2c1   :  { %v344_v39 = vpop.f32.mrf.mxu2 }
 0x2c2   :  { %v345_v40 = vadd.f32 %v420_v38, %v344_v39 }
 0x2c4   :  { %347 = vst [vmem:[#allocation7] sm:$0x3] %v345_v40 }
 0x2c5   :  { %358 = dma.vmem_to_hbm [thread:$0]  %s354_s23, 32, %s356_s26, [#allocation4]  }
 0x2c6   :  { %497 = dma.done.wait [#allocation4], 32  }
 0x2c7   :  { %498 = vsyncadd [#allocation4], 4294967264 }
 0x2c8   :  { %363 = vsyncpa [#allocation3], 1 }
 0x2c9   :  { %364 = vsyncpa [#allocation6], 1 }
 0x2ca   :  { %365 = vsyncpa [#allocation4], 1 }

</bundles_post_ra>
